<compile_context>
chip_gen: v7x
topology: tpu7x:2x2x1
jax: 0.10.0
libtpu: 0.0.40
codegen_flags: <defaults>
</compile_context>

<pallas_src>
import functools

import jax
import jax.numpy as jnp
from jax.experimental import pallas as pl
from jax.experimental.pallas import tpu as pltpu

EPS = 1e-5  # nn.InstanceNorm2d default eps


def rn_b_kernel(x_ref, m_ref, p_ref, o_ref, *, spatial, total):
    # x_ref / o_ref : (N, C_BLK, S)   feature block (channel-tiled)
    # m_ref         : (N, 1, S)       binary mask (broadcast over C in vregs)
    # p_ref         : (C_BLK, 8) f32  [0]=1+fg_gamma [1]=1+bg_gamma [2]=fg_b+bg_b
    # spatial = H*W, total = N*H*W    (static Python floats)
    x = x_ref[...].astype(jnp.float32)
    m = m_ref[...].astype(jnp.float32)

    inv_s = 1.0 / spatial

    # ---- sweep 1: first moments ---------------------------------------------
    sm = jnp.sum(m, axis=2, keepdims=True)             # (N,1,1)  fg count
    sx = jnp.sum(x, axis=2, keepdims=True)             # (N,Cb,1)
    sxm = jnp.sum(x * m, axis=2, keepdims=True)        # (N,Cb,1)

    # ---- sweep 2: shifted second moments (numerically robust variance) ------
    c = sx * inv_s                                      # per-(n,c) shift
    d = x - c
    d2 = d * d
    sd2 = jnp.sum(d2, axis=2, keepdims=True)            # (N,Cb,1)
    sd2m = jnp.sum(d2 * m, axis=2, keepdims=True)       # (N,Cb,1)
    sdm = sxm - c * sm                                   # sum m*(x-c)
    sdm_bg = (sx - spatial * c) - sdm                    # sum (1-m)*(x-c) (~0)

    # ---- per-channel region statistics (tiny (N,Cb,1) math) -----------------
    Sr_fg_raw = jnp.sum(sm, axis=0, keepdims=True)       # (1,1,1)
    Sr_bg_raw = total - Sr_fg_raw
    Sr_fg = jnp.where(Sr_fg_raw == 0.0, 1.0, Sr_fg_raw)  # Sr[Sr==0] = 1
    Sr_bg = jnp.where(Sr_bg_raw == 0.0, 1.0, Sr_bg_raw)
    mu_fg = jnp.sum(sxm, axis=0, keepdims=True) / Sr_fg          # (1,Cb,1)
    mu_bg = jnp.sum(sx - sxm, axis=0, keepdims=True) / Sr_bg     # (1,Cb,1)

    n_bg = spatial - sm                 # per-instance count of mask==0 positions

    # foreground filled-region mean / variance (mask binary => closed form)
    mean_fg = (sxm + n_bg * mu_fg) * inv_s
    dev_fg = mean_fg - c
    ss_fg = sd2m - 2.0 * dev_fg * sdm + dev_fg * dev_fg * sm
    var_fg = jnp.maximum(
        (ss_fg + n_bg * jnp.square(mu_fg - mean_fg)) * inv_s, 0.0)

    # background filled-region mean / variance
    sx_bg = sx - sxm
    mean_bg = (sx_bg + sm * mu_bg) * inv_s
    dev_bg = mean_bg - c
    ss_bg = (sd2 - sd2m) - 2.0 * dev_bg * sdm_bg + dev_bg * dev_bg * n_bg
    var_bg = jnp.maximum(
        (ss_bg + sm * jnp.square(mu_bg - mean_bg)) * inv_s, 0.0)

    # fold the sqrt(Sr / (N*H*W)) region rescale into the inv-std factor
    a_fg = jax.lax.rsqrt(var_fg + EPS) * jnp.sqrt(Sr_fg / total)   # (N,Cb,1)
    a_bg = jax.lax.rsqrt(var_bg + EPS) * jnp.sqrt(Sr_bg / total)

    # ---- fold normalize + affine into 4 per-(n,c) planes ---------------------
    p = p_ref[...]
    g_fg = p[:, 0:1][None, :, :]            # (1,Cb,1)  1 + fg_gamma
    g_bg = p[:, 1:2][None, :, :]            # (1,Cb,1)  1 + bg_gamma
    b_sum = p[:, 2:3][None, :, :]           # (1,Cb,1)  fg_beta + bg_beta

    # out(m=0) = x*a_bg*g_bg + ((mu_fg-mean_fg)*a_fg - mean_bg*a_bg)*g_bg + b_sum
    # out(m=1) = x*a_fg*g_fg + ((mu_bg-mean_bg)*a_bg - mean_fg*a_fg)*g_fg + b_sum
    p0 = a_bg * g_bg
    p1 = a_fg * g_fg - p0
    p2 = ((mu_fg - mean_fg) * a_fg - mean_bg * a_bg) * g_bg + b_sum
    p3 = ((mu_bg - mean_bg) * a_bg - mean_fg * a_fg) * g_fg + b_sum - p2

    # ---- sweep 3: normalize + affine + store (≈3 FMAs / element) -------------
    o_ref[...] = (x * (p0 + m * p1) + (p2 + m * p3)).astype(o_ref.dtype)


def _nearest_resize(mask, H, W):
    """F.interpolate(mask, size=(H, W), mode='nearest') for an NCHW mask."""
    _, _, Mh, Mw = mask.shape
    hi = (jnp.arange(H) * Mh) // H
    wi = (jnp.arange(W) * Mw) // W
    return mask[:, :, hi, :][:, :, :, wi]


def _vmem_capacity_bytes():
    try:
        return int(pltpu.get_tpu_info().vmem_capacity_bytes)
    except Exception:
        return 64 << 20          # conservative fallback: v7x per-TensorCore VMEM


def _choose_c_block(N, C, S, x_itemsize, m_itemsize, vmem_cap):
    """Largest channel block whose real working set fits ~70% of VMEM while
    keeping >= 4 channel grid steps when C allows (pipelining / megacore)."""
    if C <= 8:
        return C                                    # full-C block (== dim is legal)
    s_lane = pl.cdiv(S, 128) * 128                  # lane padding inside VMEM
    budget = int(vmem_cap * 0.70)

    def fits(cb):
        cb8 = pl.cdiv(cb, 8) * 8                    # sublane padding
        x_blk = N * cb8 * s_lane * x_itemsize       # x block (== out block)
        m_blk = N * 8 * s_lane * m_itemsize         # mask pads 1 -> 8 sublanes
        p_blk = cb8 * 128 * 4                       # params pad 8 -> 128 lanes
        dbuf = 2 * (2 * x_blk + m_blk + p_blk)      # double-buffered streams
        tmps = 3 * N * cb8 * s_lane * 4 + 2 * N * 8 * s_lane * 4   # f32 temps
        return dbuf + tmps <= budget

    cb = 8
    while cb + 8 <= C and fits(cb + 8):
        cb += 8
    # keep at least 4 grid steps when the channel count allows it
    if C >= 4 * 8:
        while cb > 8 and pl.cdiv(C, cb) < 4:
            cb -= 8
    return cb


def rn_b_forward(x, mask, fg_gamma, fg_beta, bg_gamma, bg_beta):
    """x: (N, C, H, W); mask: (N, 1, Hm, Wm) binary; params: (C,) each."""
    N, C, H, W = x.shape
    S = H * W

    # glue: nearest resize; keep mask single-channel, bf16 (binary => exact)
    mask_r = _nearest_resize(mask, H, W).astype(jnp.bfloat16).reshape(N, 1, S)
    x3 = x.reshape(N, C, S)                          # metadata-only reshape

    # packed per-channel affine constants: [1+fg_g, 1+bg_g, fg_b+bg_b, 0, ...]
    params = jnp.zeros((C, 8), jnp.float32)
    params = params.at[:, 0].set(1.0 + fg_gamma.astype(jnp.float32))
    params = params.at[:, 1].set(1.0 + bg_gamma.astype(jnp.float32))
    params = params.at[:, 2].set(fg_beta.astype(jnp.float32)
                                 + bg_beta.astype(jnp.float32))

    vmem_cap = _vmem_capacity_bytes()
    C_BLK = _choose_c_block(N, C, S, x3.dtype.itemsize,
                            mask_r.dtype.itemsize, vmem_cap)
    grid = (pl.cdiv(C, C_BLK),)

    x_spec = pl.BlockSpec((N, C_BLK, S), lambda c: (0, c, 0))
    m_spec = pl.BlockSpec((N, 1, S), lambda c: (0, 0, 0))
    p_spec = pl.BlockSpec((C_BLK, 8), lambda c: (c, 0))

    vmem_limit = min(int(vmem_cap * 0.85), vmem_cap - (4 << 20))

    out = pl.pallas_call(
        functools.partial(rn_b_kernel, spatial=float(S), total=float(N * S)),
        out_shape=jax.ShapeDtypeStruct((N, C, S), x.dtype),
        grid=grid,
        in_specs=[x_spec, m_spec, p_spec],
        out_specs=x_spec,
        compiler_params=pltpu.CompilerParams(
            dimension_semantics=("parallel",),
            vmem_limit_bytes=vmem_limit),
    )(x3, mask_r, params)

    return out.reshape(N, C, H, W)


def rn_b_reference(x, mask, fg_gamma, fg_beta, bg_gamma, bg_beta):
    """Pure-JAX reference (mirrors the PyTorch module exactly)."""
    N, C, H, W = x.shape
    mask_r = jnp.broadcast_to(_nearest_resize(mask, H, W),
                              (N, C, H, W)).astype(x.dtype)

    def rn(region, msk):
        s = jnp.sum(region, axis=(0, 2, 3))
        Sr = jnp.sum(msk, axis=(0, 2, 3))
        Sr = jnp.where(Sr == 0.0, 1.0, Sr)
        mu = s / Sr
        inp = region + (1.0 - msk) * mu[None, :, None, None]
        mean = jnp.mean(inp, axis=(2, 3), keepdims=True)
        var = jnp.mean(jnp.square(inp - mean), axis=(2, 3), keepdims=True)
        normed = (inp - mean) / jnp.sqrt(var + EPS)
        return normed * jnp.sqrt(Sr / (N * H * W))[None, :, None, None]

    rn_x = rn(x * mask_r, mask_r) + rn(x * (1.0 - mask_r), 1.0 - mask_r)
    fg = rn_x * mask_r * (1.0 + fg_gamma[None, :, None, None]) + fg_beta[None, :, None, None]
    bg = rn_x * (1.0 - mask_r) * (1.0 + bg_gamma[None, :, None, None]) + bg_beta[None, :, None, None]
    return fg + bg


if __name__ == "__main__":
    key = jax.random.PRNGKey(0)
    kx, km, k1, k2, k3, k4 = jax.random.split(key, 6)

    N, C, H, W = 2, 4, 16, 16
    # non-zero-mean activations (exercises the shifted-variance path)
    x = 1.5 + 2.0 * jax.random.normal(kx, (N, C, H, W), dtype=jnp.float32)
    # binary mask at half resolution; forward nearest-upsamples it
    mask = (jax.random.uniform(km, (N, 1, H // 2, W // 2)) > 0.5).astype(jnp.float32)

    # RN_B.__init__ parameter values (all zeros)
    zeros = jnp.zeros((C,), jnp.float32)
    out = rn_b_forward(x, mask, zeros, zeros, zeros, zeros)
    out = jax.block_until_ready(out)
    ref = rn_b_reference(x, mask, zeros, zeros, zeros, zeros)
    assert out.shape == (N, C, H, W)
    assert jnp.allclose(out, ref, rtol=1e-4, atol=1e-4), "mismatch (init params)"

    # trained-like (non-zero) affine parameters
    fg_gamma = 0.3 * jax.random.normal(k1, (C,), jnp.float32)
    fg_beta = 0.3 * jax.random.normal(k2, (C,), jnp.float32)
    bg_gamma = 0.3 * jax.random.normal(k3, (C,), jnp.float32)
    bg_beta = 0.3 * jax.random.normal(k4, (C,), jnp.float32)
    out = rn_b_forward(x, mask, fg_gamma, fg_beta, bg_gamma, bg_beta)
    ref = rn_b_reference(x, mask, fg_gamma, fg_beta, bg_gamma, bg_beta)
    assert jnp.allclose(out, ref, rtol=1e-4, atol=1e-4), "mismatch (affine params)"

    # degenerate masks (exercise the Sr == 0 clamp on both regions)
    for m_const in (jnp.zeros_like(mask), jnp.ones_like(mask)):
        out = rn_b_forward(x, m_const, fg_gamma, fg_beta, bg_gamma, bg_beta)
        ref = rn_b_reference(x, m_const, fg_gamma, fg_beta, bg_gamma, bg_beta)
        assert jnp.allclose(out, ref, rtol=1e-4, atol=1e-4), "mismatch (const mask)"

    # bf16 activations (internal math stays f32)
    x_bf16 = x.astype(jnp.bfloat16)
    out = rn_b_forward(x_bf16, mask, fg_gamma, fg_beta, bg_gamma, bg_beta)
    ref = rn_b_reference(x_bf16.astype(jnp.float32), mask,
                         fg_gamma, fg_beta, bg_gamma, bg_beta)
    assert jnp.allclose(out.astype(jnp.float32), ref,
                        rtol=5e-2, atol=5e-2), "mismatch (bf16)"

    jax.block_until_ready(out)
    print("KERNEL_OK")
</pallas_src>

<mosaic_0001>
module attributes {stable_mosaic.version = 11 : i64} {
  func.func @rn_b_kernel(%arg0: i32, %arg1: memref<2x4x256xf32, #tpu.memory_space<vmem>>, %arg2: memref<2x1x256xbf16, #tpu.memory_space<vmem>>, %arg3: memref<4x8xf32, #tpu.memory_space<vmem>>, %arg4: memref<2x4x256xf32, #tpu.memory_space<vmem>>) attributes {dimension_semantics = [#tpu.dimension_semantics<parallel>], iteration_bounds = array<i64: 1>, scalar_prefetch = 0 : i64, scratch_operands = 0 : i64, tpu.core_type = #tpu.core_type<tc>, window_params = [{transform_indices = @transform_0, window_bounds = array<i64: 2, 4, 256>}, {pipeline_mode = #tpu.pipeline_mode<synchronous>, transform_indices = @transform_1, window_bounds = array<i64: 2, 1, 256>}, {transform_indices = @transform_2, window_bounds = array<i64: 4, 8>}, {transform_indices = @transform_3, window_bounds = array<i64: 2, 4, 256>}]} {
    %c0 = arith.constant 0 : index
    %c0_0 = arith.constant 0 : index
    %c0_1 = arith.constant 0 : index
    %0 = vector.load %arg1[%c0, %c0_0, %c0_1] : memref<2x4x256xf32, #tpu.memory_space<vmem>>, vector<2x4x256xf32>
    %c0_2 = arith.constant 0 : index
    %c0_3 = arith.constant 0 : index
    %c0_4 = arith.constant 0 : index
    %1 = vector.load %arg2[%c0_2, %c0_3, %c0_4] : memref<2x1x256xbf16, #tpu.memory_space<vmem>>, vector<2x1x256xbf16>
    %2 = arith.extf %1 : vector<2x1x256xbf16> to vector<2x1x256xf32>
    %cst = arith.constant dense<0.000000e+00> : vector<2x1xf32>
    %3 = vector.multi_reduction <add>, %2, %cst [2] : vector<2x1x256xf32> to vector<2x1xf32>
    %4 = vector.shape_cast %3 : vector<2x1xf32> to vector<2x1x1xf32>
    %cst_5 = arith.constant dense<0.000000e+00> : vector<2x4xf32>
    %5 = vector.multi_reduction <add>, %0, %cst_5 [2] : vector<2x4x256xf32> to vector<2x4xf32>
    %6 = vector.shape_cast %5 : vector<2x4xf32> to vector<2x4x1xf32>
    %7 = vector.broadcast %2 : vector<2x1x256xf32> to vector<2x4x256xf32>
    %8 = arith.mulf %0, %7 : vector<2x4x256xf32>
    %cst_6 = arith.constant dense<0.000000e+00> : vector<2x4xf32>
    %9 = vector.multi_reduction <add>, %8, %cst_6 [2] : vector<2x4x256xf32> to vector<2x4xf32>
    %10 = vector.shape_cast %9 : vector<2x4xf32> to vector<2x4x1xf32>
    %cst_7 = arith.constant 3.906250e-03 : f32
    %11 = vector.broadcast %cst_7 : f32 to vector<2x4x1xf32>
    %12 = arith.mulf %6, %11 : vector<2x4x1xf32>
    %13 = vector.broadcast %12 : vector<2x4x1xf32> to vector<2x4x256xf32>
    %14 = arith.subf %0, %13 : vector<2x4x256xf32>
    %15 = arith.mulf %14, %14 : vector<2x4x256xf32>
    %cst_8 = arith.constant dense<0.000000e+00> : vector<2x4xf32>
    %16 = vector.multi_reduction <add>, %15, %cst_8 [2] : vector<2x4x256xf32> to vector<2x4xf32>
    %17 = vector.shape_cast %16 : vector<2x4xf32> to vector<2x4x1xf32>
    %18 = vector.broadcast %2 : vector<2x1x256xf32> to vector<2x4x256xf32>
    %19 = arith.mulf %15, %18 : vector<2x4x256xf32>
    %cst_9 = arith.constant dense<0.000000e+00> : vector<2x4xf32>
    %20 = vector.multi_reduction <add>, %19, %cst_9 [2] : vector<2x4x256xf32> to vector<2x4xf32>
    %21 = vector.shape_cast %20 : vector<2x4xf32> to vector<2x4x1xf32>
    %22 = vector.broadcast %4 : vector<2x1x1xf32> to vector<2x4x1xf32>
    %23 = arith.mulf %12, %22 : vector<2x4x1xf32>
    %24 = arith.subf %10, %23 : vector<2x4x1xf32>
    %cst_10 = arith.constant 2.560000e+02 : f32
    %25 = vector.broadcast %cst_10 : f32 to vector<2x4x1xf32>
    %26 = arith.mulf %25, %12 : vector<2x4x1xf32>
    %27 = arith.subf %6, %26 : vector<2x4x1xf32>
    %28 = arith.subf %27, %24 : vector<2x4x1xf32>
    %cst_11 = arith.constant dense<0.000000e+00> : vector<1x1xf32>
    %29 = vector.multi_reduction <add>, %4, %cst_11 [0] : vector<2x1x1xf32> to vector<1x1xf32>
    %30 = vector.shape_cast %29 : vector<1x1xf32> to vector<1x1x1xf32>
    %cst_12 = arith.constant 5.120000e+02 : f32
    %31 = vector.broadcast %cst_12 : f32 to vector<1x1x1xf32>
    %32 = arith.subf %31, %30 : vector<1x1x1xf32>
    %cst_13 = arith.constant 0.000000e+00 : f32
    %33 = vector.broadcast %cst_13 : f32 to vector<1x1x1xf32>
    %34 = arith.cmpf oeq, %30, %33 : vector<1x1x1xf32>
    %cst_14 = arith.constant 1.000000e+00 : f32
    %35 = vector.broadcast %cst_14 : f32 to vector<1x1x1xf32>
    %36 = arith.select %34, %35, %30 : vector<1x1x1xi1>, vector<1x1x1xf32>
    %cst_15 = arith.constant 0.000000e+00 : f32
    %37 = vector.broadcast %cst_15 : f32 to vector<1x1x1xf32>
    %38 = arith.cmpf oeq, %32, %37 : vector<1x1x1xf32>
    %cst_16 = arith.constant 1.000000e+00 : f32
    %39 = vector.broadcast %cst_16 : f32 to vector<1x1x1xf32>
    %40 = arith.select %38, %39, %32 : vector<1x1x1xi1>, vector<1x1x1xf32>
    %cst_17 = arith.constant dense<0.000000e+00> : vector<4x1xf32>
    %41 = vector.multi_reduction <add>, %10, %cst_17 [0] : vector<2x4x1xf32> to vector<4x1xf32>
    %42 = vector.shape_cast %41 : vector<4x1xf32> to vector<1x4x1xf32>
    %43 = vector.broadcast %36 : vector<1x1x1xf32> to vector<1x4x1xf32>
    %44 = arith.divf %42, %43 : vector<1x4x1xf32>
    %45 = arith.subf %6, %10 : vector<2x4x1xf32>
    %cst_18 = arith.constant dense<0.000000e+00> : vector<4x1xf32>
    %46 = vector.multi_reduction <add>, %45, %cst_18 [0] : vector<2x4x1xf32> to vector<4x1xf32>
    %47 = vector.shape_cast %46 : vector<4x1xf32> to vector<1x4x1xf32>
    %48 = vector.broadcast %40 : vector<1x1x1xf32> to vector<1x4x1xf32>
    %49 = arith.divf %47, %48 : vector<1x4x1xf32>
    %cst_19 = arith.constant 2.560000e+02 : f32
    %50 = vector.broadcast %cst_19 : f32 to vector<2x1x1xf32>
    %51 = arith.subf %50, %4 : vector<2x1x1xf32>
    %52 = vector.broadcast %51 : vector<2x1x1xf32> to vector<2x4x1xf32>
    %53 = vector.broadcast %44 : vector<1x4x1xf32> to vector<2x4x1xf32>
    %54 = arith.mulf %52, %53 : vector<2x4x1xf32>
    %55 = arith.addf %10, %54 : vector<2x4x1xf32>
    %cst_20 = arith.constant 3.906250e-03 : f32
    %56 = vector.broadcast %cst_20 : f32 to vector<2x4x1xf32>
    %57 = arith.mulf %55, %56 : vector<2x4x1xf32>
    %58 = arith.subf %57, %12 : vector<2x4x1xf32>
    %cst_21 = arith.constant 2.000000e+00 : f32
    %59 = vector.broadcast %cst_21 : f32 to vector<2x4x1xf32>
    %60 = arith.mulf %59, %58 : vector<2x4x1xf32>
    %61 = arith.mulf %60, %24 : vector<2x4x1xf32>
    %62 = arith.subf %21, %61 : vector<2x4x1xf32>
    %63 = arith.mulf %58, %58 : vector<2x4x1xf32>
    %64 = vector.broadcast %4 : vector<2x1x1xf32> to vector<2x4x1xf32>
    %65 = arith.mulf %63, %64 : vector<2x4x1xf32>
    %66 = arith.addf %62, %65 : vector<2x4x1xf32>
    %67 = vector.broadcast %44 : vector<1x4x1xf32> to vector<2x4x1xf32>
    %68 = arith.subf %67, %57 : vector<2x4x1xf32>
    %69 = arith.mulf %68, %68 : vector<2x4x1xf32>
    %70 = vector.broadcast %51 : vector<2x1x1xf32> to vector<2x4x1xf32>
    %71 = arith.mulf %70, %69 : vector<2x4x1xf32>
    %72 = arith.addf %66, %71 : vector<2x4x1xf32>
    %cst_22 = arith.constant 3.906250e-03 : f32
    %73 = vector.broadcast %cst_22 : f32 to vector<2x4x1xf32>
    %74 = arith.mulf %72, %73 : vector<2x4x1xf32>
    %cst_23 = arith.constant 0.000000e+00 : f32
    %75 = vector.broadcast %cst_23 : f32 to vector<2x4x1xf32>
    %76 = arith.maximumf %74, %75 : vector<2x4x1xf32>
    %77 = arith.subf %6, %10 : vector<2x4x1xf32>
    %78 = vector.broadcast %4 : vector<2x1x1xf32> to vector<2x4x1xf32>
    %79 = vector.broadcast %49 : vector<1x4x1xf32> to vector<2x4x1xf32>
    %80 = arith.mulf %78, %79 : vector<2x4x1xf32>
    %81 = arith.addf %77, %80 : vector<2x4x1xf32>
    %cst_24 = arith.constant 3.906250e-03 : f32
    %82 = vector.broadcast %cst_24 : f32 to vector<2x4x1xf32>
    %83 = arith.mulf %81, %82 : vector<2x4x1xf32>
    %84 = arith.subf %83, %12 : vector<2x4x1xf32>
    %85 = arith.subf %17, %21 : vector<2x4x1xf32>
    %cst_25 = arith.constant 2.000000e+00 : f32
    %86 = vector.broadcast %cst_25 : f32 to vector<2x4x1xf32>
    %87 = arith.mulf %86, %84 : vector<2x4x1xf32>
    %88 = arith.mulf %87, %28 : vector<2x4x1xf32>
    %89 = arith.subf %85, %88 : vector<2x4x1xf32>
    %90 = arith.mulf %84, %84 : vector<2x4x1xf32>
    %91 = vector.broadcast %51 : vector<2x1x1xf32> to vector<2x4x1xf32>
    %92 = arith.mulf %90, %91 : vector<2x4x1xf32>
    %93 = arith.addf %89, %92 : vector<2x4x1xf32>
    %94 = vector.broadcast %49 : vector<1x4x1xf32> to vector<2x4x1xf32>
    %95 = arith.subf %94, %83 : vector<2x4x1xf32>
    %96 = arith.mulf %95, %95 : vector<2x4x1xf32>
    %97 = vector.broadcast %4 : vector<2x1x1xf32> to vector<2x4x1xf32>
    %98 = arith.mulf %97, %96 : vector<2x4x1xf32>
    %99 = arith.addf %93, %98 : vector<2x4x1xf32>
    %cst_26 = arith.constant 3.906250e-03 : f32
    %100 = vector.broadcast %cst_26 : f32 to vector<2x4x1xf32>
    %101 = arith.mulf %99, %100 : vector<2x4x1xf32>
    %cst_27 = arith.constant 0.000000e+00 : f32
    %102 = vector.broadcast %cst_27 : f32 to vector<2x4x1xf32>
    %103 = arith.maximumf %101, %102 : vector<2x4x1xf32>
    %cst_28 = arith.constant 9.99999974E-6 : f32
    %104 = vector.broadcast %cst_28 : f32 to vector<2x4x1xf32>
    %105 = arith.addf %76, %104 : vector<2x4x1xf32>
    %106 = math.rsqrt %105 : vector<2x4x1xf32>
    %cst_29 = arith.constant 5.120000e+02 : f32
    %107 = vector.broadcast %cst_29 : f32 to vector<1x1x1xf32>
    %108 = arith.divf %36, %107 : vector<1x1x1xf32>
    %109 = math.sqrt %108 : vector<1x1x1xf32>
    %110 = vector.broadcast %109 : vector<1x1x1xf32> to vector<2x4x1xf32>
    %111 = arith.mulf %106, %110 : vector<2x4x1xf32>
    %cst_30 = arith.constant 9.99999974E-6 : f32
    %112 = vector.broadcast %cst_30 : f32 to vector<2x4x1xf32>
    %113 = arith.addf %103, %112 : vector<2x4x1xf32>
    %114 = math.rsqrt %113 : vector<2x4x1xf32>
    %cst_31 = arith.constant 5.120000e+02 : f32
    %115 = vector.broadcast %cst_31 : f32 to vector<1x1x1xf32>
    %116 = arith.divf %40, %115 : vector<1x1x1xf32>
    %117 = math.sqrt %116 : vector<1x1x1xf32>
    %118 = vector.broadcast %117 : vector<1x1x1xf32> to vector<2x4x1xf32>
    %119 = arith.mulf %114, %118 : vector<2x4x1xf32>
    %c0_32 = arith.constant 0 : index
    %c0_33 = arith.constant 0 : index
    %120 = vector.load %arg3[%c0_32, %c0_33] : memref<4x8xf32, #tpu.memory_space<vmem>>, vector<4x8xf32>
    %121 = vector.extract_strided_slice %120 {offsets = [0, 0], sizes = [4, 1], strides = [1, 1]} : vector<4x8xf32> to vector<4x1xf32>
    %122 = vector.shape_cast %121 : vector<4x1xf32> to vector<1x4x1xf32>
    %123 = vector.extract_strided_slice %120 {offsets = [0, 1], sizes = [4, 1], strides = [1, 1]} : vector<4x8xf32> to vector<4x1xf32>
    %124 = vector.shape_cast %123 : vector<4x1xf32> to vector<1x4x1xf32>
    %125 = vector.extract_strided_slice %120 {offsets = [0, 2], sizes = [4, 1], strides = [1, 1]} : vector<4x8xf32> to vector<4x1xf32>
    %126 = vector.shape_cast %125 : vector<4x1xf32> to vector<1x4x1xf32>
    %127 = vector.broadcast %124 : vector<1x4x1xf32> to vector<2x4x1xf32>
    %128 = arith.mulf %119, %127 : vector<2x4x1xf32>
    %129 = vector.broadcast %122 : vector<1x4x1xf32> to vector<2x4x1xf32>
    %130 = arith.mulf %111, %129 : vector<2x4x1xf32>
    %131 = arith.subf %130, %128 : vector<2x4x1xf32>
    %132 = vector.broadcast %44 : vector<1x4x1xf32> to vector<2x4x1xf32>
    %133 = arith.subf %132, %57 : vector<2x4x1xf32>
    %134 = arith.mulf %133, %111 : vector<2x4x1xf32>
    %135 = arith.mulf %83, %119 : vector<2x4x1xf32>
    %136 = arith.subf %134, %135 : vector<2x4x1xf32>
    %137 = vector.broadcast %124 : vector<1x4x1xf32> to vector<2x4x1xf32>
    %138 = arith.mulf %136, %137 : vector<2x4x1xf32>
    %139 = vector.broadcast %126 : vector<1x4x1xf32> to vector<2x4x1xf32>
    %140 = arith.addf %138, %139 : vector<2x4x1xf32>
    %141 = vector.broadcast %49 : vector<1x4x1xf32> to vector<2x4x1xf32>
    %142 = arith.subf %141, %83 : vector<2x4x1xf32>
    %143 = arith.mulf %142, %119 : vector<2x4x1xf32>
    %144 = arith.mulf %57, %111 : vector<2x4x1xf32>
    %145 = arith.subf %143, %144 : vector<2x4x1xf32>
    %146 = vector.broadcast %122 : vector<1x4x1xf32> to vector<2x4x1xf32>
    %147 = arith.mulf %145, %146 : vector<2x4x1xf32>
    %148 = vector.broadcast %126 : vector<1x4x1xf32> to vector<2x4x1xf32>
    %149 = arith.addf %147, %148 : vector<2x4x1xf32>
    %150 = arith.subf %149, %140 : vector<2x4x1xf32>
    %151 = vector.broadcast %2 : vector<2x1x256xf32> to vector<2x4x256xf32>
    %152 = vector.broadcast %131 : vector<2x4x1xf32> to vector<2x4x256xf32>
    %153 = arith.mulf %151, %152 : vector<2x4x256xf32>
    %154 = vector.broadcast %128 : vector<2x4x1xf32> to vector<2x4x256xf32>
    %155 = arith.addf %154, %153 : vector<2x4x256xf32>
    %156 = arith.mulf %0, %155 : vector<2x4x256xf32>
    %157 = vector.broadcast %2 : vector<2x1x256xf32> to vector<2x4x256xf32>
    %158 = vector.broadcast %150 : vector<2x4x1xf32> to vector<2x4x256xf32>
    %159 = arith.mulf %157, %158 : vector<2x4x256xf32>
    %160 = vector.broadcast %140 : vector<2x4x1xf32> to vector<2x4x256xf32>
    %161 = arith.addf %160, %159 : vector<2x4x256xf32>
    %162 = arith.addf %156, %161 : vector<2x4x256xf32>
    %c0_34 = arith.constant 0 : index
    %c0_35 = arith.constant 0 : index
    %c0_36 = arith.constant 0 : index
    %163 = vector.load %arg4[%c0_34, %c0_35, %c0_36] : memref<2x4x256xf32, #tpu.memory_space<vmem>>, vector<2x4x256xf32>
    tpu.vector_store %arg4[%c0_34, %c0_35, %c0_36], %162 {strides = array<i32>} : memref<2x4x256xf32, #tpu.memory_space<vmem>>, vector<2x4x256xf32>,
    return
  }
  func.func @transform_0(%arg0: i32) -> (i32, i32, i32) {
    %c0_i32 = arith.constant 0 : i32
    %c0_i32_0 = arith.constant 0 : i32
    %c0_i32_1 = arith.constant 0 : i32
    return %c0_i32, %arg0, %c0_i32_0 : i32, i32, i32
  }
  func.func @transform_1(%arg0: i32) -> (i32, i32, i32) {
    %c0_i32 = arith.constant 0 : i32
    %c0_i32_0 = arith.constant 0 : i32
    %c0_i32_1 = arith.constant 0 : i32
    %c0_i32_2 = arith.constant 0 : i32
    return %c0_i32, %c0_i32_0, %c0_i32_1 : i32, i32, i32
  }
  func.func @transform_2(%arg0: i32) -> (i32, i32) {
    %c0_i32 = arith.constant 0 : i32
    %c0_i32_0 = arith.constant 0 : i32
    return %arg0, %c0_i32 : i32, i32
  }
  func.func @transform_3(%arg0: i32) -> (i32, i32, i32) {
    %c0_i32 = arith.constant 0 : i32
    %c0_i32_0 = arith.constant 0 : i32
    %c0_i32_1 = arith.constant 0 : i32
    return %c0_i32, %arg0, %c0_i32_0 : i32, i32, i32
  }
}

</mosaic_0001>

<bundles_post_ra>
// kernel: tpu_custom_call.1
= control target key start
LH: loop header
LB: loop body
LE: loop exit
PB: predicated region body
PF: predicated region fallthrough
CT: control target
= control target key end

     0   :  { %8 = vsyncpa [#allocation3], 0  ;;  %s863_s0 = inlined_call_operand.hbm [shape: f32[2,4,256], index: 0, kind: input, shape index: {}]   ;;  %s864_s1 = inlined_call_operand.vmem [shape: bf16[2,1,256], index: 1, kind: input, shape index: {}]   ;;  %s865_s2 = inlined_call_operand.vmem [shape: f32[4,8], index: 2, kind: input, shape index: {}]   ;;  %s866_s3 = inlined_call_operand.hbm [shape: f32[2,4,256], index: 3, kind: output, shape index: {}]  }
   0x1   :  { %9 = vsyncpa [#allocation4], 0  ;;  %s568_s12 = smov [#allocation2]   ;;  %s520_s16 = scalar_lea.hbm %s863_s0, 256 }
   0x2   :  { %s15_s13 = sshll.u32 %s568_s12, 4  ;;  %p521_p0 = scmp.ne.s32.totalorder %s863_s0, %s520_s16  ;;  %s16_s13 = int_to_ptr.vmem [resolvable:$true] %s15_s13 }
   0x3   :  { %p524_p1 = scmp.lt.u32.totalorder %s520_s16, %s863_s0 }
   0x5   :  { %p526_p2 = pnand %p524_p1, %p521_p0 }
   0x7   :  { %529 = shalt.err (!%p526_p2)
}
   0x8   :  { %s530_s21 = scalar_lea.vmem %s16_s13, 256  ;;  %p535_p4 = scmp.lt.s32.totalorder %s16_s13, %s16_s13 }
   0x9   :  { %p531_p3 = scmp.ne.s32.totalorder %s16_s13, %s530_s21  ;;  %p536_p5 = scmp.lt.s32.totalorder %s530_s21, %s530_s21 }
   0xb   :  { %p537_p6 = por %p536_p5, %p535_p4 }
   0xd   :  { %p538_p7 = pnand %p537_p6, %p531_p3 }
   0xf   :  { %541 = shalt.err (!%p538_p7)
}
  0x10   :  { %s569_s22 = smov 128   ;;  %s570_s23 = smov 8  }
  0x11   :  { %21 = dma.hbm_to_vmem [thread:$0]  %s863_s0, 256, %s16_s13, [#allocation3], %s569_s22, %s569_s22, %s570_s23  }
  0x12   :  { %564 = dma.done.wait [#allocation3], 256  }
  0x13   :  { %565 = vsyncadd [#allocation3], 4294967040  ;;  %v37_v0 = vlaneseq  ;;  %vm74_vm0 = vcmask 1043456   ;;  %v614_v4 = vld [vmem:[#allocation2] sm:$0xff]  ;;  %v619_v6 = vld [vmem:[#allocation2 + $0x8] sm:$0xff]  ;;  %vm57_vm1 = vcmask 1040384  }
  0x14   :  { %v31_v5 = vld [vmem:[%s864_s1] sm:$0x3]  ;;  %v70_v7 = vcombine.high %v614_v4, %v614_v4  ;;  %v75_v8 = vsel %vm74_vm0, %v614_v4, 0.0  ;;  %v71_v10 = vcombine.high %v619_v6, %v619_v6  ;;  %v32_v11 = vld [vmem:[%s864_s1 + $0x2] sm:$0x3]  ;;  %v80_v12 = vsel %vm74_vm0, %v619_v6, 0.0 }
  0x15   :  { %v38_v1 = vshrl.u32 %v37_v0, 7  ;;  %v33_v9 = vunpack.c.l.bf16 %v31_v5  ;;  %v34_v13 = vunpack.c.l.bf16 %v32_v11  ;;  %v571_v44 = vmov 839922192   ;;  %s572_s30 = smov 127   ;;  %s573_s4 = smov 126  }
  0x16   :  { %v76_v14 = vsel %vm74_vm0, %v70_v7, 0.0  ;;  %v81_v17 = vsel %vm74_vm0, %v71_v10, 0.0  ;;  %v132_v45 = vunpack.c.l.s4 %v571_v44 }
  0x17   :  { %v612_v2 = vsub.s32 0, %v38_v1  ;;  %v43_v3 = vsub.s32 2, %v38_v1  ;;  %v77_v18 = vadd.f32 %v76_v14, %v75_v8  ;;  %v82_v19 = vadd.f32 %v81_v17, %v80_v12 }
  0x18   :  { %v133_v46 = vunpack.c.0.s8 %v132_v45 }
  0x19   :  { %v40_v15 = vrot.slane %v33_v9, %v612_v2  ;;  %v44_v16 = vrot.slane %v33_v9, %v43_v3  ;;  %v48_v20 = vrot.slane %v34_v13, %v612_v2  ;;  %v52_v21 = vrot.slane %v34_v13, %v43_v3  ;;  %78 = vadd.xlane.f32.xlu0 %v77_v18 }
  0x1a   :  { %v136_v48 = vsub.s32 %v133_v46, %v38_v1 }
  0x1b   :  { %v58_v22 = vsel %vm57_vm1, %v40_v15, 0.0  ;;  %v59_v23 = vsel %vm57_vm1, %v44_v16, 0.0  ;;  %v639_v24 = vrot.slane %v40_v15, %v612_v2  ;;  %v642_v25 = vrot.slane %v44_v16, %v612_v2 }
  0x1c   :  { %v60_v26 = vadd.f32 %v59_v23, %v58_v22  ;;  %v63_v27 = vsel %vm57_vm1, %v48_v20, 0.0  ;;  %v64_v28 = vsel %vm57_vm1, %v52_v21, 0.0  ;;  %v647_v29 = vrot.slane %v48_v20, %v612_v2 }
  0x1d   :  { %v650_v30 = vrot.slane %v52_v21, %v612_v2  ;;  %v105_v31 = vcombine.low %v639_v24, %v642_v25  ;;  %v65_v32 = vadd.f32 %v64_v28, %v63_v27  ;;  %83 = vadd.xlane.f32.xlu0 %v82_v19 }
  0x1e   :  { %61 = vadd.xlane.f32.xlu1 %v60_v26 }
  0x1f   :  { %v656_v33 = vcombine.low %v647_v29, %v650_v30  ;;  %v109_v34 = vmul.f32 %v105_v31, %v614_v4 }
  0x21   :  { %v110_v35 = vmul.f32 %v656_v33, %v619_v6  ;;  %v113_v36 = vcombine.high %v109_v34, %v109_v34  ;;  %v117_v37 = vsel %vm74_vm0, %v109_v34, 0.0 }
  0x22   :  { %66 = vadd.xlane.f32.xlu1 %v65_v32 }
  0x23   :  { %v114_v38 = vcombine.high %v110_v35, %v110_v35  ;;  %v122_v39 = vsel %vm74_vm0, %v110_v35, 0.0  ;;  %v118_v40 = vsel %vm74_vm0, %v113_v36, 0.0 }
  0x24   :  { %v119_v41 = vadd.f32 %v118_v40, %v117_v37 }
  0x25   :  { %v123_v42 = vsel %vm74_vm0, %v114_v38, 0.0 }
  0x26   :  { %v124_v43 = vadd.f32 %v123_v42, %v122_v39  ;;  %120 = vadd.xlane.f32.xlu0 %v119_v41 }
  0x28   :  { %125 = vadd.xlane.f32.xlu1 %v124_v43 }
  0xa6   :  { %v79_v47 = vpop.xlane.xlu0 %78 }
  0xa7   :  { %v665_v49 = vmul.f32 0.00390625, %v79_v47 }
  0xa9   :  { %v197_v51 = vmul.f32 256.0, %v665_v49  ;;  %v137_v53 = vrot.slane %v665_v49, %v136_v48 }
  0xaa   :  { %v84_v52 = vpop.xlane.xlu0 %83 }
  0xab   :  { %v667_v50 = vpop.xlane.xlu1 %61  ;;  %v199_v54 = vsub.f32 %v79_v47, %v197_v51  ;;  %v673_v56 = vmul.f32 0.00390625, %v84_v52  ;;  %v147_v58 = vsub.f32 %v614_v4, %v137_v53 }
  0xac   :  { %v203_v55 = vsel %vm57_vm1, %v667_v50, 0.0  ;;  %v692_v7 = vrot.slane %v667_v50, %v612_v2 }
  0xad   :  { %v198_v59 = vmul.f32 256.0, %v673_v56  ;;  %v149_v62 = vmul.f32 %v147_v58, %v147_v58  ;;  %v144_v12 = vrot.slane %v673_v56, %v136_v48 }
  0xae   :  { %v193_v22 = vmul.f32 %v692_v7, %v665_v49 }
  0xaf   :  { %v675_v57 = vpop.xlane.xlu1 %66  ;;  %v200_v63 = vsub.f32 %v84_v52, %v198_v59  ;;  %v153_v5 = vcombine.high %v149_v62, %v149_v62  ;;  %v167_v9 = vmul.f32 %v149_v62, %v105_v31  ;;  %v157_v18 = vsel %vm74_vm0, %v149_v62, 0.0 }
  0xb0   :  { %v204_v60 = vsel %vm57_vm1, %v675_v57, 0.0  ;;  %v685_v0 = vrot.slane %v675_v57, %v612_v2  ;;  %v148_v26 = vsub.f32 %v619_v6, %v144_v12 }
  0xb1   :  { %v681_v61 = vadd.f32 %v204_v60, %v203_v55  ;;  %v158_v11 = vsel %vm74_vm0, %v153_v5, 0.0  ;;  %v171_v21 = vcombine.high %v167_v9, %v167_v9  ;;  %v175_v32 = vsel %vm74_vm0, %v167_v9, 0.0 }
  0xb2   :  { %v194_v16 = vmul.f32 %v685_v0, %v673_v56  ;;  %v159_v20 = vadd.f32 %v158_v11, %v157_v18  ;;  %v150_v34 = vmul.f32 %v148_v26, %v148_v26  ;;  %v574_v11 = vmov 1  }
  0xb3   :  { %v206_v1 = vsub.f32 512.0, %v681_v61  ;;  %v688_v3 = vpop.xlane.xlu0 %120  ;;  %v176_v27 = vsel %vm74_vm0, %v171_v21, 0.0  ;;  %497 = vset.pattern.permute.xlu0 %v574_v11  ;;  %496 = vset.pattern.permute.xlu1 %v574_v11  ;;  %vm207_vm3 = vcmp.eq.f32.partialorder %v681_v61, 0.0 }
  0xb4   :  { %v220_v8 = vsub.f32 %v79_v47, %v688_v3  ;;  %160 = vadd.xlane.f32.xlu0 %v159_v20  ;;  %v714_v28 = vsub.f32 %v688_v3, %v193_v22  ;;  %v177_v35 = vadd.f32 %v176_v27, %v175_v32  ;;  %v154_v38 = vcombine.high %v150_v34, %v150_v34 }
  0xb5   :  { %vm209_vm2 = vcmp.eq.f32.partialorder %v206_v1, 0.0  ;;  %v695_v10 = vpop.xlane.xlu1 %125  ;;  %v168_v39 = vmul.f32 %v150_v34, %v656_v33  ;;  %v162_v40 = vsel %vm74_vm0, %v150_v34, 0.0  ;;  %v208_v12 = vsel %vm207_vm3, 1.0, %v681_v61 }
  0xb6   :  { %v699_v13 = vsel %vm209_vm2, 1.0, %v206_v1  ;;  %v221_v14 = vsub.f32 %v84_v52, %v695_v10  ;;  %v222_v15 = vsel %vm74_vm0, %v220_v8, 0.0  ;;  %v717_v31 = vsub.f32 %v695_v10, %v194_v16  ;;  %v746_v1 = vld [vmem:[%s865_s2] sm:$0xf]  ;;  %s576_s2 = smov [#allocation5]  }
  0xb7   :  { %v228_v17 = vrot.slane %v699_v13, %v612_v2  ;;  %v201_v36 = vsub.f32 %v199_v54, %v714_v28  ;;  %v163_v41 = vsel %vm74_vm0, %v154_v38, 0.0  ;;  %v172_v42 = vcombine.high %v168_v39, %v168_v39  ;;  %s475_s5 = sshll.u32 %s576_s2, 4  ;;  %s476_s5 = int_to_ptr.vmem [resolvable:$true] %s475_s5 }
  0xb8   :  { %v223_v19 = vsel %vm74_vm0, %v221_v14, 0.0  ;;  %v202_v37 = vsub.f32 %v200_v63, %v717_v31  ;;  %178 = vadd.xlane.f32.xlu0 %v177_v35  ;;  %v164_v43 = vadd.f32 %v163_v41, %v162_v40  ;;  %v180_v46 = vsel %vm74_vm0, %v168_v39, 0.0  ;;  %s542_s6 = scalar_lea.vmem %s476_s5, 256  ;;  %p547_p9 = scmp.lt.s32.totalorder %s476_s5, %s476_s5 }
  0xb9   :  { %504 = vrcp.f32 %v228_v17  ;;  %v224_v23 = vadd.f32 %v223_v19, %v222_v15  ;;  %v181_v44 = vsel %vm74_vm0, %v172_v42, 0.0  ;;  %v212_v15 = vsel %vm74_vm0, %v695_v10, 0.0  ;;  %p543_p8 = scmp.ne.s32.totalorder %s476_s5, %s542_s6  ;;  %p548_p10 = scmp.lt.s32.totalorder %s542_s6, %s542_s6 }
  0xba   :  { %165 = vadd.xlane.f32.xlu1 %v164_v43  ;;  %v182_v48 = vadd.f32 %v181_v44, %v180_v46  ;;  %v211_v16 = vsel %vm74_vm0, %v688_v3, 0.0  ;;  %v231_v17 = vsub.f32 256.0, %v667_v50  ;;  %v232_v22 = vsub.f32 256.0, %v675_v57 }
  0xbb   :  { %v213_v18 = vadd.f32 %v212_v15, %v211_v16  ;;  %v780_v38 = vmul.f32 0.001953125, %v699_v13  ;;  %p549_p11 = por %p548_p10, %p547_p9 }
  0xbc   :  { %v236_v20 = vrot.slane %v231_v17, %v612_v2  ;;  %v240_v61 = vrot.slane %v232_v22, %v612_v2 }
  0xbd   :  { %vm333_vm5 = vcmp.eq.f32.partialorder %v780_v38, inf  ;;  %vm335_vm7 = vcmp.eq.f32.partialorder %v780_v38, 0.0  ;;  %p550_p12 = pnand %p549_p11, %p543_p8 }
  0xbe   :  { %183 = vadd.xlane.f32.xlu1 %v182_v48 }
  0xc3   :  { %v505_v45 = vpop.eup %504 }
  0xc4   :  { %v230_v47 = vmul.f32 %v505_v45, %v224_v23 }
  0xc6   :  { %v273_v51 = vmul.f32 %v230_v47, %v692_v7  ;;  %v274_v33 = vmul.f32 %v230_v47, %v685_v0 }
  0xc8   :  { %v275_v52 = vadd.f32 %v273_v51, %v220_v8  ;;  %v276_v53 = vadd.f32 %v274_v33, %v221_v14  ;;  %v217_v14 = vrot.slane %v208_v12, %v612_v2 }
  0xca   :  { %v729_v54 = vmul.f32 0.00390625, %v275_v52  ;;  %v734_v58 = vmul.f32 0.00390625, %v276_v53  ;;  %506 = vrcp.f32 %v217_v14 }
  0xcc   :  { %v732_v55 = vsub.f32 %v230_v47, %v729_v54  ;;  %v279_v59 = vsub.f32 %v729_v54, %v665_v49  ;;  %v280_v62 = vsub.f32 %v734_v58, %v673_v56  ;;  %v741_v63 = vsub.f32 %v230_v47, %v734_v58 }
  0xce   :  { %v283_v60 = vmul.f32 2.0, %v279_v59  ;;  %v284_v8 = vmul.f32 2.0, %v280_v62  ;;  %368 = vrot.lane.b32.xlu0 %v746_v1, %s572_s30  ;;  %v289_v41 = vmul.f32 %v279_v59, %v279_v59  ;;  %v297_v13 = vmul.f32 %v732_v55, %v732_v55 }
  0xcf   :  { %381 = vrot.lane.b32.xlu1 %v746_v1, %s573_s4 }
  0xd0   :  { %v285_v5 = vmul.f32 %v283_v60, %v201_v36  ;;  %v750_v9 = vmul.f32 %v284_v8, %v202_v37  ;;  %v774_v36 = vmul.f32 0.001953125, %v208_v12  ;;  %v299_v53 = vmul.f32 %v297_v13, %v692_v7 }
  0xd1   :  { %v290_v12 = vmul.f32 %v280_v62, %v280_v62  ;;  %v336_v13 = vand.u32 2147483648, %v780_v38 }
  0xd2   :  { %508 = vrsqrt.f32 %v774_v36  ;;  %vm315_vm4 = vcmp.eq.f32.partialorder %v774_v36, inf  ;;  %vm317_vm6 = vcmp.eq.f32.partialorder %v774_v36, 0.0 }
  0xd3   :  { %510 = vrsqrt.f32 %v780_v38 }
  0xd4   :  { %v507_v19 = vpop.eup %506 }
  0xd5   :  { %v219_v21 = vmul.f32 %v507_v19, %v213_v18 }
  0xd7   :  { %v241_v23 = vmul.f32 %v236_v20, %v219_v21  ;;  %v242_v27 = vmul.f32 %v240_v61, %v219_v21 }
  0xd9   :  { %v243_v26 = vadd.f32 %v241_v23, %v688_v3  ;;  %v244_v34 = vadd.f32 %v242_v27, %v695_v10  ;;  %v292_v27 = vmul.f32 %v290_v12, %v240_v61 }
  0xdb   :  { %v767_v32 = vmul.f32 0.00390625, %v243_v26  ;;  %v772_v35 = vmul.f32 0.00390625, %v244_v34 }
  0xdc   :  { %v509_v19 = vpop.eup %508 }
  0xdd   :  { %v247_v50 = vsub.f32 %v767_v32, %v665_v49  ;;  %v777_v37 = vsub.f32 %v219_v21, %v767_v32  ;;  %v248_v40 = vsub.f32 %v772_v35, %v673_v56  ;;  %v793_v56 = vsub.f32 %v219_v21, %v772_v35  ;;  %v511_v23 = vpop.eup %510 }
  0xdf   :  { %v249_v57 = vmul.f32 2.0, %v247_v50  ;;  %v255_v39 = vmul.f32 %v247_v50, %v247_v50  ;;  %v263_v10 = vmul.f32 %v777_v37, %v777_v37  ;;  %v250_v46 = vmul.f32 2.0, %v248_v40 }
  0xe0   :  { %v256_v52 = vmul.f32 %v248_v40, %v248_v40  ;;  %v264_v8 = vmul.f32 %v793_v56, %v793_v56 }
  0xe1   :  { %v251_v49 = vmul.f32 %v249_v57, %v714_v28  ;;  %v257_v43 = vmul.f32 %v255_v39, %v692_v7  ;;  %v265_v47 = vmul.f32 %v263_v10, %v236_v20  ;;  %v291_v28 = vmul.f32 %v289_v41, %v236_v20 }
  0xe2   :  { %v252_v16 = vmul.f32 %v250_v46, %v717_v31  ;;  %v258_v18 = vmul.f32 %v256_v52, %v685_v0  ;;  %v266_v26 = vmul.f32 %v264_v8, %v240_v61  ;;  %v332_v10 = vmul.f32 %v511_v23, %v780_v38 }
 0x141   :  { %v161_v3 = vpop.xlane.xlu0 %160 }
 0x145   :  { %v179_v42 = vpop.xlane.xlu0 %178 }
 0x146   :  { %v253_v44 = vsub.f32 %v179_v42, %v251_v49  ;;  %v281_v45 = vsub.f32 %v161_v3, %v179_v42  ;;  %v314_v3 = vmul.f32 %v509_v19, %v774_v36  ;;  %v318_v42 = vand.u32 2147483648, %v774_v36 }
 0x147   :  { %v166_v33 = vpop.xlane.xlu1 %165 }
 0x148   :  { %v259_v48 = vadd.f32 %v257_v43, %v253_v44  ;;  %v287_v51 = vsub.f32 %v281_v45, %v285_v5  ;;  %v298_v5 = vmul.f32 %v741_v63, %v741_v63  ;;  %v334_v44 = vsel %vm333_vm5, %v780_v38, %v332_v10 }
 0x14a   :  { %v267_v59 = vadd.f32 %v265_v47, %v259_v48  ;;  %v293_v60 = vadd.f32 %v291_v28, %v287_v51  ;;  %v300_v31 = vmul.f32 %v298_v5, %v685_v0  ;;  %v337_v48 = vsel %vm335_vm7, %v336_v13, %v334_v44  ;;  %v369_v5 = vpop.permute.xlu0 %368 }
 0x14b   :  { %v184_v17 = vpop.xlane.xlu1 %183 }
 0x14c   :  { %v269_v14 = vmul.f32 0.00390625, %v267_v59  ;;  %v301_v15 = vadd.f32 %v299_v53, %v293_v60  ;;  %v254_v7 = vsub.f32 %v184_v17, %v252_v16  ;;  %v282_v22 = vsub.f32 %v166_v33, %v184_v17 }
 0x14e   :  { %v271_v20 = vmax.f32 %v269_v14, 0.0  ;;  %v303_v21 = vmul.f32 0.00390625, %v301_v15  ;;  %v260_v50 = vadd.f32 %v258_v18, %v254_v7  ;;  %v288_v57 = vsub.f32 %v282_v22, %v750_v9 }
 0x14f   :  { %v316_v9 = vsel %vm315_vm4, %v774_v36, %v314_v3  ;;  %v341_v36 = vrot.slane %v337_v48, %v612_v2 }
 0x150   :  { %v305_v34 = vmax.f32 %v303_v21, 0.0  ;;  %v307_v62 = vadd.f32 1e-05, %v271_v20  ;;  %v268_v40 = vadd.f32 %v266_v26, %v260_v50  ;;  %v294_v49 = vadd.f32 %v292_v27, %v288_v57 }
 0x151   :  { %v319_v47 = vsel %vm317_vm6, %v318_v42, %v316_v9 }
 0x152   :  { %512 = vrsqrt.f32 %v307_v62  ;;  %v326_v39 = vadd.f32 1e-05, %v305_v34  ;;  %v270_v61 = vmul.f32 0.00390625, %v268_v40  ;;  %v302_v41 = vadd.f32 %v300_v31, %v294_v49 }
 0x153   :  { %v323_v51 = vrot.slane %v319_v47, %v612_v2 }
 0x154   :  { %514 = vrsqrt.f32 %v326_v39  ;;  %v272_v0 = vmax.f32 %v270_v61, 0.0  ;;  %v304_v43 = vmul.f32 0.00390625, %v302_v41 }
 0x156   :  { %v306_v45 = vmax.f32 %v304_v43, 0.0  ;;  %v308_v46 = vadd.f32 1e-05, %v272_v0 }
 0x158   :  { %516 = vrsqrt.f32 %v308_v46  ;;  %v327_v28 = vadd.f32 1e-05, %v306_v45 }
 0x15a   :  { %518 = vrsqrt.f32 %v327_v28 }
 0x15c   :  { %v513_v33 = vpop.eup %512 }
 0x15d   :  { %v324_v52 = vmul.f32 %v513_v33, %v323_v51 }
 0x15e   :  { %v515_v53 = vpop.eup %514 }
 0x15f   :  { %v342_v59 = vmul.f32 %v515_v53, %v341_v36  ;;  %v375_v60 = vmul.f32 %v324_v52, %v767_v32  ;;  %v359_v12 = vmul.f32 %v324_v52, %v777_v37 }
 0x161   :  { %v345_v8 = vmul.f32 %v746_v1, %v342_v59  ;;  %v373_v38 = vmul.f32 %v342_v59, %v732_v55  ;;  %v361_v14 = vmul.f32 %v342_v59, %v729_v54 }
 0x162   :  { %v517_v17 = vpop.eup %516 }
 0x163   :  { %351 = vrot.lane.b32.xlu1 %v345_v8, %s572_s30  ;;  %v377_v15 = vsub.f32 %v373_v38, %v375_v60  ;;  %v363_v16 = vsub.f32 %v359_v12, %v361_v14  ;;  %v325_v18 = vmul.f32 %v517_v17, %v323_v51 }
 0x164   :  { %v519_v19 = vpop.eup %518 }
 0x165   :  { %v365_v2 = vmul.f32 %v363_v16, %v746_v1  ;;  %v343_v20 = vmul.f32 %v519_v19, %v341_v36  ;;  %v376_v32 = vmul.f32 %v325_v18, %v772_v35  ;;  %v360_v37 = vmul.f32 %v325_v18, %v793_v56 }
 0x166   :  { %v575_v35 = vmov 0   ;;  %v379_v62 = vmul.f32 %v377_v15, %v746_v1  ;;  %v348_v50 = vmul.f32 %v746_v1, %v325_v18 }
 0x167   :  { %v371_v21 = vadd.f32 %v369_v5, %v365_v2  ;;  %v374_v55 = vmul.f32 %v343_v20, %v741_v63  ;;  %v362_v54 = vmul.f32 %v343_v20, %v734_v58  ;;  %v346_v7 = vmul.f32 %v746_v1, %v343_v20  ;;  %v382_v63 = vpop.permute.xlu1 %381 }
 0x168   :  { %v347_v58 = vmul.f32 %v746_v1, %v324_v52  ;;  %v384_v40 = vadd.f32 %v382_v63, %v379_v62 }
 0x169   :  { %388 = vrot.lane.b32.xlu0 %v371_v21, %s572_s30  ;;  %v378_v22 = vsub.f32 %v374_v55, %v376_v32  ;;  %v364_v23 = vsub.f32 %v360_v37, %v362_v54  ;;  %353 = vrot.lane.b32.xlu1 %v346_v7, %s572_s30 }
 0x16b   :  { %v366_v26 = vmul.f32 %v364_v23, %v746_v1  ;;  %v380_v39 = vmul.f32 %v378_v22, %v746_v1 }
 0x16d   :  { %415 = vperm.xlu0 %497, %v346_v7   ;;  %v372_v27 = vadd.f32 %v369_v5, %v366_v26  ;;  %v385_v61 = vadd.f32 %v382_v63, %v380_v39 }
 0x16f   :  { %390 = vrot.lane.b32.xlu1 %v372_v27, %s572_s30 }
 0x171   :  { %498 = vset.pattern.permute.xlu0 %v575_v35 }
 0x173   :  { %411 = vperm.xlu1 %496, %v345_v8  }
 0x177   :  { %499 = vset.pattern.permute.xlu1 %v575_v35 }
 0x1d5   :  { %v352_v56 = vpop.permute.xlu1 %351 }
 0x1d6   :  { %v357_v34 = vsub.f32 %v347_v58, %v352_v56 }
 0x1d8   :  { %398 = vperm.xlu0 %498, %v357_v34  }
 0x1db   :  { %v354_v57 = vpop.permute.xlu1 %353  ;;  %v389_v3 = vpop.permute.xlu0 %388 }
 0x1dc   :  { %500 = vset.pattern.permute.xlu0 %v574_v11  ;;  %v358_v31 = vsub.f32 %v348_v50, %v354_v57  ;;  %v394_v49 = vsub.f32 %v384_v40, %v389_v3 }
 0x1dd   :  { %447 = vperm.xlu0 %500, %v371_v21  }
 0x1de   :  { %403 = vperm.xlu1 %499, %v358_v31  }
 0x1e1   :  { %v391_v10 = vpop.permute.xlu1 %390 }
 0x1e2   :  { %434 = vperm.xlu1 %499, %v394_v49   ;;  %v395_v41 = vsub.f32 %v385_v61, %v391_v10 }
 0x1e6   :  { %439 = vperm.xlu1 %499, %v395_v41  }
 0x1ea   :  { %501 = vset.pattern.permute.xlu1 %v574_v11 }
 0x1eb   :  { %451 = vperm.xlu1 %501, %v372_v27  }
 0x1ec   :  { %v416_v42 = vpop.permute.xlu0 %415 }
 0x1f2   :  { %v412_v0 = vpop.permute.xlu1 %411 }
 0x257   :  { %v399_v9 = vpop.permute.xlu0 %398 }
 0x258   :  { %v406_v43 = vmul.f32 %v399_v9, %v639_v24  ;;  %v407_v13 = vmul.f32 %v399_v9, %v642_v25 }
 0x25a   :  { %v418_v1 = vadd.f32 %v412_v0, %v406_v43  ;;  %v419_v45 = vadd.f32 %v412_v0, %v407_v13 }
 0x25c   :  { %v426_v48 = vcombine.low %v418_v1, %v419_v45  ;;  %v448_v33 = vpop.permute.xlu0 %447 }
 0x25d   :  { %v404_v44 = vpop.permute.xlu1 %403 }
 0x25e   :  { %v408_v46 = vmul.f32 %v404_v44, %v647_v29  ;;  %v409_v47 = vmul.f32 %v404_v44, %v650_v30  ;;  %v430_v38 = vmul.f32 %v426_v48, %v614_v4 }
 0x260   :  { %v420_v53 = vadd.f32 %v416_v42, %v408_v46  ;;  %v421_v59 = vadd.f32 %v416_v42, %v409_v47 }
 0x261   :  { %v435_v28 = vpop.permute.xlu1 %434 }
 0x262   :  { %v442_v51 = vmul.f32 %v435_v28, %v639_v24  ;;  %v443_v11 = vmul.f32 %v435_v28, %v642_v25  ;;  %v427_v14 = vcombine.low %v420_v53, %v421_v59 }
 0x264   :  { %v454_v36 = vadd.f32 %v448_v33, %v442_v51  ;;  %v455_v52 = vadd.f32 %v448_v33, %v443_v11  ;;  %v431_v25 = vmul.f32 %v427_v14, %v619_v6 }
 0x265   :  { %v440_v60 = vpop.permute.xlu1 %439 }
 0x266   :  { %v462_v8 = vcombine.low %v454_v36, %v455_v52  ;;  %v444_v15 = vmul.f32 %v440_v60, %v647_v29  ;;  %v445_v16 = vmul.f32 %v440_v60, %v650_v30 }
 0x268   :  { %v466_v12 = vadd.f32 %v462_v8, %v430_v38 }
 0x26a   :  { %v452_v17 = vpop.permute.xlu1 %451  ;;  %468 = vst [vmem:[#allocation5] sm:$0xff] %v466_v12 }
 0x26b   :  { %v456_v24 = vadd.f32 %v452_v17, %v444_v15  ;;  %v457_v18 = vadd.f32 %v452_v17, %v445_v16 }
 0x26d   :  { %v463_v2 = vcombine.low %v456_v24, %v457_v18 }
 0x26f   :  { %v467_v5 = vadd.f32 %v463_v2, %v431_v25 }
 0x271   :  { %469 = vst [vmem:[#allocation5 + $0x8] sm:$0xff] %v467_v5 }
 0x272   :  { %553 = shalt.err (!%p550_p12)
}
 0x273   :  { %s554_s9 = scalar_lea.hbm %s866_s3, 256 }
 0x274   :  { %p555_p13 = scmp.ne.s32.totalorder %s866_s3, %s554_s9  ;;  %p558_p0 = scmp.lt.u32.totalorder %s554_s9, %s866_s3 }
 0x276   :  { %p560_p1 = pnand %p558_p0, %p555_p13 }
 0x278   :  { %563 = shalt.err (!%p560_p1)
}
 0x279   :  { %481 = dma.vmem_to_hbm [thread:$0]  %s476_s5, 256, %s866_s3, [#allocation4], %s569_s22, %s569_s22, %s570_s23  }
 0x27a   :  { %566 = dma.done.wait [#allocation4], 256  }
 0x27b   :  { %567 = vsyncadd [#allocation4], 4294967040 }
 0x27c   :  { %485 = vsyncpa [#allocation3], 1 }
 0x27d   :  { %486 = vsyncpa [#allocation4], 1 }

</bundles_post_ra>
